<compile_context>
chip_gen: v5e
topology: v5e:2x2
jax: 0.10.0
libtpu: 0.0.40
codegen_flags: <defaults>
</compile_context>

<pallas_src>
import numpy as np
import jax
import jax.numpy as jnp
from jax.experimental import pallas as pl
from jax.experimental.pallas import tpu as pltpu

_SMALL_BYPASS_BYTES = 1 << 20   # below ~1 MiB output, an XLA concat fusion wins
_MAX_TH = 1024                  # past ~512-1024 lanes the copy is already at roofline


def _all_weights_kernel(w0_ref, w1_ref, w2_ref, tail_ref, out_ref):
    # Block shapes (TH = lane slab of the hidden/column dim):
    #   w0_ref:   (TH, IN)      rows j..j+TH of layers.0.weight
    #   w1_ref:   (TH, H)       rows j..j+TH of layers.1.weight
    #   w2_ref:   (TH, H)       rows j..j+TH of layers.2.weight
    #   tail_ref: (OUT+3, TH)   cols j..j+TH of [W3; b0; b1; b2]
    #   out_ref:  (R, TH)       column slab of the output, R = IN + 2H + OUT + 3
    d_in = w0_ref.shape[1]
    h = w1_ref.shape[1]
    tail_rows = tail_ref.shape[0]

    # XLU transposes feeding lane-dense stores; all large-section row offsets are
    # 8-aligned when IN and H are multiples of 8, so only the small tail store masks.
    out_ref[0:d_in, :] = w0_ref[...].T                       # layers.0.weight.T
    out_ref[d_in:d_in + h, :] = w1_ref[...].T                # layers.1.weight.T
    out_ref[d_in + h:d_in + 2 * h, :] = w2_ref[...].T        # layers.2.weight.T
    r = d_in + 2 * h
    out_ref[r:r + tail_rows, :] = tail_ref[...]              # W3 + b0 + b1 + b2 (fused)


def _pallas_all_weights(w0, w1, w2, tail):
    h, d_in = w0.shape
    tail_rows = tail.shape[0]               # OUT + 3
    rows = d_in + 2 * h + tail_rows
    itemsize = jnp.dtype(w0.dtype).itemsize

    # Pad the column (hidden) axis to a multiple of 128 so slabs stay lane-dense and
    # the grid keeps >= 1 full 128-lane step even for awkward H.
    hp = ((h + 127) // 128) * 128
    if hp != h:
        pad = hp - h
        w0 = jnp.pad(w0, ((0, pad), (0, 0)))
        w1 = jnp.pad(w1, ((0, pad), (0, 0)))
        w2 = jnp.pad(w2, ((0, pad), (0, 0)))
        tail = jnp.pad(tail, ((0, 0), (0, pad)))

    # Per-generation VMEM sizing (v7x: 64 MiB physical, v6e/v5e: 128 MiB).
    try:
        cap = int(getattr(pltpu.get_tpu_info(), "vmem_capacity_bytes", 64 << 20))
    except Exception:  # be robust on unusual backends / interpret mode
        cap = 64 << 20
    budget = cap // 2

    def step_bytes(th):
        # double-buffered input blocks + output slab, plus headroom for transpose temps
        per_step = th * (d_in + 2 * h + tail_rows + rows) * itemsize
        return 2 * per_step + 2 * th * h * itemsize

    th = 128
    cand = 128
    while cand <= hp and cand <= _MAX_TH:
        if (hp % cand == 0
                and step_bytes(cand) <= budget
                and (hp < 256 or hp // cand >= 2)):   # keep >=2 steps for v7x megacore
            th = cand
        cand += 128

    # TODO(synk): for very large H on v5e (step_bytes(128) > budget) a second grid axis
    # over output row-groups would shrink the resident slab further; we raise the scoped
    # VMEM limit instead, which covers practical NeF sizes.
    vmem_limit = int(min(cap * 3 // 4, max(budget, step_bytes(th) + (4 << 20))))

    out = pl.pallas_call(
        _all_weights_kernel,
        out_shape=jax.ShapeDtypeStruct((rows, hp), w0.dtype),
        grid_spec=pltpu.PrefetchScalarGridSpec(
            num_scalar_prefetch=0,
            grid=(hp // th,),
            in_specs=[
                pl.BlockSpec((th, d_in), lambda i: (i, 0)),       # W0 rows -> out cols
                pl.BlockSpec((th, h), lambda i: (i, 0)),          # W1 rows -> out cols
                pl.BlockSpec((th, h), lambda i: (i, 0)),          # W2 rows -> out cols
                pl.BlockSpec((tail_rows, th), lambda i: (0, i)),  # fused tail cols
            ],
            out_specs=pl.BlockSpec((rows, th), lambda i: (0, i)),
        ),
        compiler_params=pltpu.CompilerParams(
            dimension_semantics=("parallel",),
            vmem_limit_bytes=vmem_limit,
        ),
    )(w0, w1, w2, tail)

    if hp != h:
        out = out[:, :h]
    return out


def all_weights_3d_forward(state_dict, y, *, force_kernel=False):
    del y  # AllWeights3D.forward ignores y

    w0 = state_dict["layers.0.weight"]          # (H, IN)
    w1 = state_dict["layers.1.weight"]          # (H, H)
    w2 = state_dict["layers.2.weight"]          # (H, H)
    w3 = state_dict["layers.3.weight"]          # (OUT, H)
    b0 = state_dict["layers.0.bias"]            # (H,)
    b1 = state_dict["layers.1.bias"]
    b2 = state_dict["layers.2.bias"]

    # Explicit common-dtype cast so a mixed-dtype state_dict can't trip the kernel.
    dtype = jnp.result_type(w0, w1, w2, w3, b0, b1, b2)
    w0 = w0.astype(dtype)
    w1 = w1.astype(dtype)
    w2 = w2.astype(dtype)
    # Fuse W3 + the three bias rows into one (OUT+3, H) tail (tiny wrapper-side concat).
    tail = jnp.concatenate(
        [w3.astype(dtype), b0[None, :].astype(dtype),
         b1[None, :].astype(dtype), b2[None, :].astype(dtype)],
        axis=0,
    )

    h, d_in = w0.shape
    rows = d_in + 2 * h + tail.shape[0]
    total_bytes = rows * h * jnp.dtype(dtype).itemsize

    if force_kernel or total_bytes >= _SMALL_BYPASS_BYTES:
        all_weights = _pallas_all_weights(w0, w1, w2, tail)
    else:
        # Tiny case: pallas launch overhead dominates; plain XLA concat is at least as fast.
        all_weights = jnp.concatenate([w0.T, w1.T, w2.T, tail], axis=0)

    return all_weights, state_dict["layers.3.bias"]


def _reference_all_weights(state_dict):
    return jnp.concatenate(
        [
            state_dict["layers.0.weight"].T,
            state_dict["layers.1.weight"].T,
            state_dict["layers.2.weight"].T,
            state_dict["layers.3.weight"],
            state_dict["layers.0.bias"][None, :],
            state_dict["layers.1.bias"][None, :],
            state_dict["layers.2.bias"][None, :],
        ],
        axis=0,
    )


def _make_state_dict(key, d_in, h, d_out):
    ks = jax.random.split(key, 8)
    return {
        "layers.0.weight": 0.1 * jax.random.normal(ks[0], (h, d_in), jnp.float32),
        "layers.0.bias":   0.1 * jax.random.normal(ks[1], (h,), jnp.float32),
        "layers.1.weight": 0.1 * jax.random.normal(ks[2], (h, h), jnp.float32),
        "layers.1.bias":   0.1 * jax.random.normal(ks[3], (h,), jnp.float32),
        "layers.2.weight": 0.1 * jax.random.normal(ks[4], (h, h), jnp.float32),
        "layers.2.bias":   0.1 * jax.random.normal(ks[5], (h,), jnp.float32),
        "layers.3.weight": 0.1 * jax.random.normal(ks[6], (d_out, h), jnp.float32),
        "layers.3.bias":   0.1 * jax.random.normal(ks[7], (d_out,), jnp.float32),
    }


if __name__ == "__main__":
    key = jax.random.PRNGKey(0)

    # Small NeF-style occupancy MLP: 32-d (pos-enc) input, hidden 256, scalar output.
    # H=256 gives a 2-step parallel grid (exercises tiling / both v7x TCs).
    IN, H, OUT = 32, 256, 1
    sd = _make_state_dict(key, IN, H, OUT)

    all_weights, last_bias = all_weights_3d_forward(sd, y="plane", force_kernel=True)
    all_weights = jax.block_until_ready(all_weights)

    ref = jax.block_until_ready(_reference_all_weights(sd))
    assert all_weights.shape == (IN + 2 * H + OUT + 3, H)
    assert all_weights.dtype == jnp.float32
    assert np.array_equal(np.asarray(all_weights), np.asarray(ref)), "kernel mismatch vs reference"
    assert np.array_equal(np.asarray(last_bias), np.asarray(sd["layers.3.bias"]))

    # Non-multiple-of-128 hidden dim: exercises the pad-and-slice path.
    sd2 = _make_state_dict(jax.random.PRNGKey(1), 32, 192, 1)
    aw2, lb2 = all_weights_3d_forward(sd2, y=None, force_kernel=True)
    aw2 = jax.block_until_ready(aw2)
    assert np.array_equal(np.asarray(aw2), np.asarray(_reference_all_weights(sd2)))
    assert np.array_equal(np.asarray(lb2), np.asarray(sd2["layers.3.bias"]))

    # Default dispatch (tiny size -> XLA concat bypass) must agree too.
    aw3, _ = all_weights_3d_forward(sd, y="plane")
    assert np.array_equal(np.asarray(jax.block_until_ready(aw3)), np.asarray(ref))

    print("KERNEL_OK")
</pallas_src>

<mosaic_0001>
module attributes {stable_mosaic.version = 11 : i64} {
  func.func @_all_weights_kernel(%arg0: i32, %arg1: memref<128x32xf32, #tpu.memory_space<vmem>>, %arg2: memref<128x256xf32, #tpu.memory_space<vmem>>, %arg3: memref<128x256xf32, #tpu.memory_space<vmem>>, %arg4: memref<4x128xf32, #tpu.memory_space<vmem>>, %arg5: memref<548x128xf32, #tpu.memory_space<vmem>>) attributes {dimension_semantics = [#tpu.dimension_semantics<parallel>], iteration_bounds = array<i64: 2>, scalar_prefetch = 0 : i64, scratch_operands = 0 : i64, tpu.core_type = #tpu.core_type<tc>, window_params = [{transform_indices = @transform_0, window_bounds = array<i64: 128, 32>}, {transform_indices = @transform_1, window_bounds = array<i64: 128, 256>}, {transform_indices = @transform_2, window_bounds = array<i64: 128, 256>}, {transform_indices = @transform_3, window_bounds = array<i64: 4, 128>}, {transform_indices = @transform_4, window_bounds = array<i64: 548, 128>}]} {
    %c0 = arith.constant 0 : index
    %c0_0 = arith.constant 0 : index
    %0 = vector.load %arg1[%c0, %c0_0] : memref<128x32xf32, #tpu.memory_space<vmem>>, vector<128x32xf32>
    %1 = tpu.transpose %0, [1, 0] : vector<128x32xf32> -> vector<32x128xf32>
    %c0_1 = arith.constant 0 : index
    %c0_2 = arith.constant 0 : index
    %2 = vector.load %arg5[%c0_1, %c0_2] : memref<548x128xf32, #tpu.memory_space<vmem>>, vector<32x128xf32>
    tpu.vector_store %arg5[%c0_1, %c0_2], %1 {strides = array<i32>} : memref<548x128xf32, #tpu.memory_space<vmem>>, vector<32x128xf32>,
    %c0_3 = arith.constant 0 : index
    %c0_4 = arith.constant 0 : index
    %3 = vector.load %arg2[%c0_3, %c0_4] : memref<128x256xf32, #tpu.memory_space<vmem>>, vector<128x256xf32>
    %4 = tpu.transpose %3, [1, 0] : vector<128x256xf32> -> vector<256x128xf32>
    %c32 = arith.constant 32 : index
    %c0_5 = arith.constant 0 : index
    %5 = vector.load %arg5[%c32, %c0_5] : memref<548x128xf32, #tpu.memory_space<vmem>>, vector<256x128xf32>
    tpu.vector_store %arg5[%c32, %c0_5], %4 {strides = array<i32>} : memref<548x128xf32, #tpu.memory_space<vmem>>, vector<256x128xf32>,
    %c0_6 = arith.constant 0 : index
    %c0_7 = arith.constant 0 : index
    %6 = vector.load %arg3[%c0_6, %c0_7] : memref<128x256xf32, #tpu.memory_space<vmem>>, vector<128x256xf32>
    %7 = tpu.transpose %6, [1, 0] : vector<128x256xf32> -> vector<256x128xf32>
    %c288 = arith.constant 288 : index
    %c0_8 = arith.constant 0 : index
    %8 = vector.load %arg5[%c288, %c0_8] : memref<548x128xf32, #tpu.memory_space<vmem>>, vector<256x128xf32>
    tpu.vector_store %arg5[%c288, %c0_8], %7 {strides = array<i32>} : memref<548x128xf32, #tpu.memory_space<vmem>>, vector<256x128xf32>,
    %c0_9 = arith.constant 0 : index
    %c0_10 = arith.constant 0 : index
    %9 = vector.load %arg4[%c0_9, %c0_10] : memref<4x128xf32, #tpu.memory_space<vmem>>, vector<4x128xf32>
    %c544 = arith.constant 544 : index
    %c0_11 = arith.constant 0 : index
    %10 = vector.load %arg5[%c544, %c0_11] : memref<548x128xf32, #tpu.memory_space<vmem>>, vector<4x128xf32>
    tpu.vector_store %arg5[%c544, %c0_11], %9 {strides = array<i32>} : memref<548x128xf32, #tpu.memory_space<vmem>>, vector<4x128xf32>,
    return
  }
  func.func @transform_0(%arg0: i32) -> (i32, i32) {
    %c0_i32 = arith.constant 0 : i32
    %c0_i32_0 = arith.constant 0 : i32
    return %arg0, %c0_i32 : i32, i32
  }
  func.func @transform_1(%arg0: i32) -> (i32, i32) {
    %c0_i32 = arith.constant 0 : i32
    %c0_i32_0 = arith.constant 0 : i32
    return %arg0, %c0_i32 : i32, i32
  }
  func.func @transform_2(%arg0: i32) -> (i32, i32) {
    %c0_i32 = arith.constant 0 : i32
    %c0_i32_0 = arith.constant 0 : i32
    return %arg0, %c0_i32 : i32, i32
  }
  func.func @transform_3(%arg0: i32) -> (i32, i32) {
    %c0_i32 = arith.constant 0 : i32
    %c0_i32_0 = arith.constant 0 : i32
    return %c0_i32, %arg0 : i32, i32
  }
  func.func @transform_4(%arg0: i32) -> (i32, i32) {
    %c0_i32 = arith.constant 0 : i32
    %c0_i32_0 = arith.constant 0 : i32
    return %c0_i32, %arg0 : i32, i32
  }
}

</mosaic_0001>

<bundles_post_ra>
// kernel: tpu_custom_call.1
= control target key start
LH: loop header
LB: loop body
LE: loop exit
PB: predicated region body
PF: predicated region fallthrough
CT: control target
= control target key end

     0   :  { %s1327_s0 = inlined_call_operand.vmem [shape: f32[256,32], index: 0, kind: input, shape index: {}]   ;;  %s1328_s1 = inlined_call_operand.hbm [shape: f32[256,256], index: 1, kind: input, shape index: {}]   ;;  %s1329_s2 = inlined_call_operand.hbm [shape: f32[256,256], index: 2, kind: input, shape index: {}]   ;;  %s1330_s3 = inlined_call_operand.vmem [shape: f32[4,256], index: 3, kind: input, shape index: {}]   ;;  %s1331_s4 = inlined_call_operand.hbm [shape: f32[548,256], index: 4, kind: output, shape index: {}]  }
   0x1   :  { %1332 = sst [smem:[#allocation12_spill]] %s1328_s1 }
   0x2   :  { %9 = vsyncpa [#allocation3], 0 }
   0x3   :  { %11 = vsyncpa [#allocation3 + $0x1], 0 }
   0x4   :  { %12 = vsyncpa [#allocation6], 0 }
   0x5   :  { %14 = vsyncpa [#allocation6 + $0x1], 0 }
   0x6   :  { %15 = vsyncpa [#allocation4], 0 }
   0x7   :  { %17 = vsyncpa [#allocation4 + $0x1], 0  ;;  %s991_s15 = smov 0   ;;  %s993_s16 = smov 0  }
   0x8   :  { %s995_s17 = smov 0   ;;  %s997_s18 = smov 0  }
   0x9 LB: > { %s1012_s19 = sadd.s32 4294967295, %s959_s18   ;;  %s748_s20 = sadd.s32 4294967294, %s959_s18   ;;  %s959_s18 = sphi %s997_s18, %s1346_s18   ;;  %s955_s17 = sphi %s995_s17, %s1345_s17   ;;  %s951_s16 = sphi %s993_s16, %s1344_s16   ;;  %s947_s15 = sphi %s991_s15, %s1343_s15  }
   0xa   : > { %s1016_s21 = sadd.s32 1, %s959_s18   ;;  %s56_s22 = sadd.s32 1, %s955_s17 }
   0xb   : > { %s53_s23 = ssub.s32 %s959_s18, %s1016_s21  ;;  %p63_p0 = scmp.ne.s32.totalorder %s955_s17, %s951_s16 }
   0xc   : > { %p54_p1 = scmp.eq.s32.totalorder %s53_s23, 0  ;;  %p64_p2 = scmp.eq.s32.totalorder %s959_s18, 0 }
   0xd   : > { %p69_p3 = scmp.ne.s32.totalorder %s951_s16, %s947_s15  ;;  %p70_p4 = scmp.eq.s32.totalorder %s1012_s19, 0 }
   0xe   : > { %s1028_s24 = scalar_select %p54_p1, %s955_s17, %s56_s22  }
   0xf   : > { %p1030_p5 = por %p64_p2, %p63_p0  ;;  %p1034_p6 = por %p70_p4, %p69_p3 }
  0x10   : > { %1333 = sst [smem:[#allocation11_spill]] %s1028_s24  ;;  %p145_p7 = scmp.eq.s32.totalorder %s1012_s19, 1 }
  0x11   : > { %p151_p8 = scmp.eq.s32.totalorder %s748_s20, 1  ;;  %p790_p10 = scmp.lt.s32.totalorder %s959_s18, 2 }
  0x12   : > { %p1041_p11 = por %p145_p7, %p63_p0  ;;  %s1050_s29 = sand.u32 1, %s955_s17  }
  0x13   : > { %p1045_p12 = por %p151_p8, %p69_p3  ;;  %s769_s30 = sshll.u32 %s959_s18, 8 }
  0x14   : > { %s751_s5 = sshll.u32 %s1050_s29, 8  ;;  %s1338_s1 = sld [smem:[#allocation12_spill]] }
  0x15   : > { %s184_s10 = scalar_lea.vmem [#allocation2], %s751_s5  ;;  %p1063_p13 = pnand %p790_p10, %p1030_p5 }
  0x16   : > { %s193_s11 = sshll.u32 %s184_s10, 4  ;;  %p759_p0 = scmp.ge.s32.totalorder %s959_s18, 1  ;;  %s194_s11 = int_to_ptr.vmem [resolvable:$true] %s193_s11 }
  0x17   : > { %p231_p1 = scmp.lt.s32.totalorder %s959_s18, 3  ;;  %s181_s13 = scalar_lea.sflag [#allocation3], %s1050_s29 }
  0x18   : > { %p833_p3 = pneg %p1063_p13 }
  0x1a   : > { %s190_s8 = scalar_lea.hbm %s1338_s1, %s769_s30  ;;  %s836_s25 = scalar_lea.hbm %s1338_s1, 512 }
  0x1b   : > { %s191_s9 = sshll.u32 %s190_s8, 4  ;;  %s192_s9 = int_to_ptr.hbm [resolvable:$true] %s191_s9 }
  0x1c   : > { %s829_s14 = sshra.s32 %s192_s9, 4  ;;  %s830_s14 = int_to_ptr.hbm [resolvable:$true] %s829_s14 }
  0x1d   : > { %s831_s20 = scalar_lea.hbm %s830_s14, 256  ;;  %p837_p5 = scmp.lt.s32.totalorder %s830_s14, %s1338_s1 }
  0x1e   : > { %p832_p2 = scmp.ne.s32.totalorder %s830_s14, %s831_s20  ;;  %p838_p8 = scmp.lt.s32.totalorder %s836_s25, %s831_s20 }
  0x20   : > { %p834_p4 = pnand %p833_p3, %p832_p2  ;;  %p839_p10 = por %p838_p8, %p837_p5 }
  0x22   : > { %p835_p7 = pneg %p834_p4 }
  0x24   : > { %p840_p9 = pnand %p839_p10, %p835_p7 }
  0x26   : > { %843 = shalt.err (!%p840_p9)
}
  0x27   : > { %s961_s8 = smov 256   ;;  %s962_s10 = smov 16  }
  0x28   : > { %782 = dma.hbm_to_vmem [thread:$0]  (!%p1063_p13), %s192_s9, 4096, %s194_s11, %s181_s13, %s961_s8, %s961_s8, %s962_s10  }
  0x29   : > { %p1087_p2 = pnand %p759_p0, %p231_p1  ;;  %s213_s23 = scalar_lea.hbm %s1329_s2, %s769_s30 }
  0x2a   : > { %s214_s25 = sshll.u32 %s213_s23, 4  ;;  %s207_s6 = scalar_lea.vmem [#allocation5], %s751_s5  ;;  %s215_s25 = int_to_ptr.hbm [resolvable:$true] %s214_s25 }
  0x2b   : > { %s216_s7 = sshll.u32 %s207_s6, 4  ;;  %s204_s1 = scalar_lea.sflag [#allocation6], %s1050_s29  ;;  %s217_s7 = int_to_ptr.vmem [resolvable:$true] %s216_s7 }
  0x2c   : > { %s859_s24 = sshra.s32 %s215_s25, 4  ;;  %s866_s14 = scalar_lea.hbm %s1329_s2, 512  ;;  %s860_s24 = int_to_ptr.hbm [resolvable:$true] %s859_s24 }
  0x2d   : > { %s861_s9 = scalar_lea.hbm %s860_s24, 256  ;;  %p867_p4 = scmp.lt.s32.totalorder %s860_s24, %s1329_s2 }
  0x2e   : > { %p862_p9 = scmp.ne.s32.totalorder %s860_s24, %s861_s9  ;;  %p868_p7 = scmp.lt.s32.totalorder %s866_s14, %s861_s9 }
  0x30   : > { %p864_p0 = pnand %p862_p9, %p833_p3  ;;  %p869_p5 = por %p868_p7, %p867_p4 }
  0x32   : > { %p865_p1 = pneg %p864_p0 }
  0x34   : > { %p870_p8 = pnand %p869_p5, %p865_p1 }
  0x36   : > { %873 = shalt.err (!%p870_p8)
}
  0x37   : > { %785 = dma.hbm_to_vmem [thread:$0]  (!%p1063_p13), %s215_s25, 4096, %s217_s7, %s204_s1, %s961_s8, %s961_s8, %s962_s10  }
  0x38   : > { %235 = sbr.rel (%p1087_p2) target bundleno = 489 (0x1e9), region = 36  ;;  %s1113_s29 = sand.u32 (!%p1087_p2), 1, %s951_s16  }
  0x39   : > { %s760_s5 = sshll.u32 (!%p1087_p2), %s1113_s29, 8  ;;  %s238_s23 = scalar_lea.sflag (!%p1087_p2), [#allocation3], %s1113_s29 }
  0x3a   : > { %s1117_s6 = scalar_lea.vmem (!%p1087_p2), [#allocation2], %s760_s5 }
  0x3d   : > { %934 = dma.done.wait (%p1034_p6), %s238_s23, 4096  }
  0x3e   : > { %936 = vsyncadd (%p1034_p6), %s238_s23, 4294963200  ;;  %s248_s1 = scalar_lea.sflag [#allocation6], %s1113_s29  ;;  %s1124_s24 = scalar_lea.vmem [#allocation5], %s760_s5 }
  0x3f   : > { %938 = dma.done.wait (%p1034_p6), %s248_s1, 4096  }
  0x40   : > { %940 = vsyncadd (%p1034_p6), %s248_s1, 4294963200  ;;  %s762_s12 = sshll.u32 %s1012_s19, 4  ;;  %v355_v0 = vld [vmem:[%s1117_s6] sm:$0xff]  ;;  %v357_v2 = vld [vmem:[%s1117_s6 + $0x10] sm:$0xff]  ;;  %s772_s26 = smul.u32 552, %s1113_s29 }
  0x41   : > { %p292_p13 = scmp.lt.s32.totalorder %s762_s12, 31  ;;  %387 = vxpose.xlu1.b32.start [1/16] %v355_v0, 128  ;;  %v359_v4 = vld [vmem:[%s1117_s6 + $0x20] sm:$0xff]  ;;  %v361_v6 = vld [vmem:[%s1117_s6 + $0x30] sm:$0xff]  ;;  %v356_v28 = vld [vmem:[%s1117_s6 + $0x8] sm:$0xff]  ;;  %p299_p6 = scmp.lt.s32.totalorder %s1012_s19, 1 }
  0x42   : > { %v363_v8 = vld [vmem:[%s1117_s6 + $0x40] sm:$0xff]  ;;  %v365_v10 = vld [vmem:[%s1117_s6 + $0x50] sm:$0xff]  ;;  %419 = vxpose.xlu2.b32.start [1/16] %v356_v28, 128  ;;  %v358_v31 = vld [vmem:[%s1117_s6 + $0x18] sm:$0xff]  ;;  %s1187_s7 = scalar_lea.vmem [#allocation7], %s772_s26  ;;  %s765_s20 = sshll.u32 %s1012_s19, 3 }
  0x43   : > { %s1348_s12 = smov (!%p292_p13, %s762_s12), 31  ;;  %v367_v12 = vld [vmem:[%s1117_s6 + $0x60] sm:$0xff]  ;;  %v369_v14 = vld [vmem:[%s1117_s6 + $0x70] sm:$0xff]  ;;  %v360_v34 = vld [vmem:[%s1117_s6 + $0x28] sm:$0xff]  ;;  %s625_s1 = sshll.u32 %s1187_s7, 4  ;;  %s626_s1 = int_to_ptr.vmem [resolvable:$true] %s625_s1 }
  0x44   : > { %s763_s8 = sshll.u32 %s1348_s12, 3  ;;  %v371_v16 = vld [vmem:[%s1117_s6 + $0x80] sm:$0xff]  ;;  %v373_v18 = vld [vmem:[%s1117_s6 + $0x90] sm:$0xff]  ;;  %v484_v35 = vld [vmem:[%s1124_s24 + $0x8] sm:$0xff]  ;;  %s614_s12 = scalar_lea.sflag [#allocation4], %s1113_s29 }
  0x45   : > { %s1134_s25 = scalar_lea.vmem %s1327_s0, %s763_s8  ;;  %v375_v20 = vld [vmem:[%s1117_s6 + $0xa0] sm:$0xff]  ;;  %v377_v22 = vld [vmem:[%s1117_s6 + $0xb0] sm:$0xff]  ;;  %v362_v37 = vld [vmem:[%s1117_s6 + $0x38] sm:$0xff] }
  0x46   : > { %v303_v1 = vld [vmem:[%s1134_s25] sm:$0xff]  ;;  %v304_v3 = vld [vmem:[%s1134_s25 + $0x8] sm:$0xff]  ;;  %v305_v5 = vld [vmem:[%s1134_s25 + $0x10] sm:$0xff]  ;;  %s300_s9 = scalar_select %p299_p6, %s1012_s19, 1 }
  0x47   : > { %319 = vxpose.xlu0.b32.start [1/16] (narrow) %v303_v1, 32  ;;  %v306_v7 = vld [vmem:[%s1134_s25 + $0x18] sm:$0xff]  ;;  %v307_v9 = vld [vmem:[%s1134_s25 + $0x20] sm:$0xff]  ;;  %v308_v11 = vld [vmem:[%s1134_s25 + $0x28] sm:$0xff] }
  0x48   : > { %v309_v13 = vld [vmem:[%s1134_s25 + $0x30] sm:$0xff]  ;;  %v310_v15 = vld [vmem:[%s1134_s25 + $0x38] sm:$0xff]  ;;  %v311_v17 = vld [vmem:[%s1134_s25 + $0x40] sm:$0xff]  ;;  %s764_s11 = sshll.u32 %s300_s9, 2 }
  0x49   : > { %388 = vxpose.xlu1.b32.cont [2/16] %v357_v2, 128  ;;  %v312_v19 = vld [vmem:[%s1134_s25 + $0x48] sm:$0xff]  ;;  %v313_v21 = vld [vmem:[%s1134_s25 + $0x50] sm:$0xff]  ;;  %v314_v23 = vld [vmem:[%s1134_s25 + $0x58] sm:$0xff]  ;;  %s302_s30 = scalar_lea.vmem %s1330_s3, %s764_s11 }
  0x4a   : > { %v379_v24 = vld [vmem:[%s1117_s6 + $0xc0] sm:$0xff]  ;;  %v381_v26 = vld [vmem:[%s1117_s6 + $0xd0] sm:$0xff]  ;;  %v316_v27 = vld [vmem:[%s1134_s25 + $0x68] sm:$0xff]  ;;  %420 = vxpose.xlu2.b32.cont [2/16] %v358_v31, 128 }
  0x4b   : > { %v315_v25 = vld [vmem:[%s1134_s25 + $0x60] sm:$0xff]  ;;  %v317_v30 = vld [vmem:[%s1134_s25 + $0x70] sm:$0xff]  ;;  %v318_v33 = vld [vmem:[%s1134_s25 + $0x78] sm:$0xff]  ;;  %s909_s25 = scalar_lea.hbm %s1331_s4, 1104 }
  0x4c   : > { %v383_v29 = vld [vmem:[%s1117_s6 + $0xe0] sm:$0xff]  ;;  %v385_v32 = vld [vmem:[%s1117_s6 + $0xf0] sm:$0xff]  ;;  %v486_v38 = vld [vmem:[%s1124_s24 + $0x18] sm:$0xff] }
  0x4d   : > { %v483_v36 = vld [vmem:[%s1124_s24] sm:$0xff]  ;;  %v485_v39 = vld [vmem:[%s1124_s24 + $0x10] sm:$0xff]  ;;  %v364_v40 = vld [vmem:[%s1117_s6 + $0x48] sm:$0xff] }
  0x4e   : > { %v488_v41 = vld [vmem:[%s1124_s24 + $0x28] sm:$0xff]  ;;  %v487_v42 = vld [vmem:[%s1124_s24 + $0x20] sm:$0xff]  ;;  %v366_v43 = vld [vmem:[%s1117_s6 + $0x58] sm:$0xff] }
  0x4f   : > { %320 = vxpose.xlu0.b32.cont [2/16] (narrow) %v304_v3, 32  ;;  %v490_v44 = vld [vmem:[%s1124_s24 + $0x38] sm:$0xff]  ;;  %v489_v45 = vld [vmem:[%s1124_s24 + $0x30] sm:$0xff]  ;;  %v368_v46 = vld [vmem:[%s1117_s6 + $0x68] sm:$0xff] }
  0x50   : > { %v492_v47 = vld [vmem:[%s1124_s24 + $0x48] sm:$0xff]  ;;  %v491_v48 = vld [vmem:[%s1124_s24 + $0x40] sm:$0xff]  ;;  %v370_v49 = vld [vmem:[%s1117_s6 + $0x78] sm:$0xff] }
  0x51   : > { %389 = vxpose.xlu1.b32.cont [3/16] %v359_v4, 128  ;;  %v494_v51 = vld [vmem:[%s1124_s24 + $0x58] sm:$0xff]  ;;  %v493_v52 = vld [vmem:[%s1124_s24 + $0x50] sm:$0xff]  ;;  %v372_v53 = vld [vmem:[%s1117_s6 + $0x88] sm:$0xff] }
  0x52   : > { %421 = vxpose.xlu2.b32.cont [3/16] %v360_v34, 128  ;;  %v496_v55 = vld [vmem:[%s1124_s24 + $0x68] sm:$0xff]  ;;  %v495_v56 = vld [vmem:[%s1124_s24 + $0x60] sm:$0xff]  ;;  %v374_v57 = vld [vmem:[%s1117_s6 + $0x98] sm:$0xff] }
  0x53   : > { %v498_v59 = vld [vmem:[%s1124_s24 + $0x78] sm:$0xff]  ;;  %v497_v60 = vld [vmem:[%s1124_s24 + $0x70] sm:$0xff]  ;;  %v376_v61 = vld [vmem:[%s1117_s6 + $0xa8] sm:$0xff] }
  0x54   : > { %v500_v63 = vld [vmem:[%s1124_s24 + $0x88] sm:$0xff]  ;;  %v499_v0 = vld [vmem:[%s1124_s24 + $0x80] sm:$0xff]  ;;  %v378_v1 = vld [vmem:[%s1117_s6 + $0xb8] sm:$0xff] }
  0x55   : > { %v502_v3 = vld [vmem:[%s1124_s24 + $0x98] sm:$0xff]  ;;  %v501_v4 = vld [vmem:[%s1124_s24 + $0x90] sm:$0xff] }
  0x56   : > { %v514_v28 = vld [vmem:[%s1124_s24 + $0xf8] sm:$0xff] }
  0x57   : > { %321 = vxpose.xlu0.b32.cont [3/16] (narrow) %v305_v5, 32  ;;  %v380_v5 = vld [vmem:[%s1117_s6 + $0xc8] sm:$0xff] }
  0x59   : > { %390 = vxpose.xlu1.b32.cont [4/16] %v361_v6, 128 }
  0x5a   : > { %422 = vxpose.xlu2.b32.cont [4/16] %v362_v37, 128 }
  0x5f   : > { %322 = vxpose.xlu0.b32.cont [4/16] (narrow) %v306_v7, 32  ;;  %v504_v7 = vld [vmem:[%s1124_s24 + $0xa8] sm:$0xff] }
  0x61   : > { %391 = vxpose.xlu1.b32.cont [5/16] %v363_v8, 128  ;;  %v503_v8 = vld [vmem:[%s1124_s24 + $0xa0] sm:$0xff] }
  0x62   : > { %423 = vxpose.xlu2.b32.cont [5/16] %v364_v40, 128 }
  0x67   : > { %323 = vxpose.xlu0.b32.cont [5/16] (narrow) %v307_v9, 32  ;;  %v382_v9 = vld [vmem:[%s1117_s6 + $0xd8] sm:$0xff] }
  0x69   : > { %392 = vxpose.xlu1.b32.cont [6/16] %v365_v10, 128 }
  0x6a   : > { %424 = vxpose.xlu2.b32.cont [6/16] %v366_v43, 128 }
  0x6f   : > { %324 = vxpose.xlu0.b32.cont [6/16] (narrow) %v308_v11, 32  ;;  %v506_v11 = vld [vmem:[%s1124_s24 + $0xb8] sm:$0xff] }
  0x71   : > { %393 = vxpose.xlu1.b32.cont [7/16] %v367_v12, 128  ;;  %v505_v12 = vld [vmem:[%s1124_s24 + $0xb0] sm:$0xff] }
  0x72   : > { %425 = vxpose.xlu2.b32.cont [7/16] %v368_v46, 128 }
  0x77   : > { %325 = vxpose.xlu0.b32.cont [7/16] (narrow) %v309_v13, 32  ;;  %v384_v13 = vld [vmem:[%s1117_s6 + $0xe8] sm:$0xff] }
  0x79   : > { %394 = vxpose.xlu1.b32.cont [8/16] %v369_v14, 128 }
  0x7a   : > { %426 = vxpose.xlu2.b32.cont [8/16] %v370_v49, 128 }
  0x7f   : > { %326 = vxpose.xlu0.b32.cont [8/16] (narrow) %v310_v15, 32  ;;  %v508_v15 = vld [vmem:[%s1124_s24 + $0xc8] sm:$0xff] }
  0x81   : > { %395 = vxpose.xlu1.b32.cont [9/16] %v371_v16, 128  ;;  %v507_v16 = vld [vmem:[%s1124_s24 + $0xc0] sm:$0xff] }
  0x82   : > { %427 = vxpose.xlu2.b32.cont [9/16] %v372_v53, 128 }
  0x87   : > { %327 = vxpose.xlu0.b32.cont [9/16] (narrow) %v311_v17, 32  ;;  %v386_v17 = vld [vmem:[%s1117_s6 + $0xf8] sm:$0xff]  ;;  %s624_s6 = scalar_lea.hbm %s1331_s4, %s765_s20 }
  0x89   : > { %396 = vxpose.xlu1.b32.cont [10/16] %v373_v18, 128 }
  0x8a   : > { %428 = vxpose.xlu2.b32.cont [10/16] %v374_v57, 128 }
  0x8f   : > { %328 = vxpose.xlu0.b32.cont [10/16] (narrow) %v312_v19, 32 }
  0x91   : > { %397 = vxpose.xlu1.b32.cont [11/16] %v375_v20, 128  ;;  %v510_v20 = vld [vmem:[%s1124_s24 + $0xd8] sm:$0xff] }
  0x92   : > { %429 = vxpose.xlu2.b32.cont [11/16] %v376_v61, 128 }
  0x97   : > { %329 = vxpose.xlu0.b32.cont [11/16] (narrow) %v313_v21, 32  ;;  %v509_v21 = vld [vmem:[%s1124_s24 + $0xd0] sm:$0xff] }
  0x99   : > { %398 = vxpose.xlu1.b32.cont [12/16] %v377_v22, 128 }
  0x9a   : > { %430 = vxpose.xlu2.b32.cont [12/16] %v378_v1, 128 }
  0x9f   : > { %330 = vxpose.xlu0.b32.cont [12/16] (narrow) %v314_v23, 32 }
  0xa1   : > { %399 = vxpose.xlu1.b32.cont [13/16] %v379_v24, 128  ;;  %v512_v24 = vld [vmem:[%s1124_s24 + $0xe8] sm:$0xff] }
  0xa2   : > { %431 = vxpose.xlu2.b32.cont [13/16] %v380_v5, 128 }
  0xa7   : > { %331 = vxpose.xlu0.b32.cont [13/16] (narrow) %v315_v25, 32  ;;  %v511_v25 = vld [vmem:[%s1124_s24 + $0xe0] sm:$0xff] }
  0xa9   : > { %400 = vxpose.xlu1.b32.cont [14/16] %v381_v26, 128 }
  0xaa   : > { %432 = vxpose.xlu2.b32.cont [14/16] %v382_v9, 128 }
  0xaf   : > { %332 = vxpose.xlu0.b32.cont [14/16] (narrow) %v316_v27, 32 }
  0xb1   : > { %401 = vxpose.xlu1.b32.cont [15/16] %v383_v29, 128  ;;  %v513_v29 = vld [vmem:[%s1124_s24 + $0xf0] sm:$0xff]  ;;  %s627_s24 = sshll.u32 %s624_s6, 4  ;;  %s628_s24 = int_to_ptr.hbm [resolvable:$true] %s627_s24 }
  0xb2   : > { %433 = vxpose.xlu2.b32.cont [15/16] %v384_v13, 128  ;;  %s903_s8 = sshra.s32 %s628_s24, 4  ;;  %s904_s8 = int_to_ptr.hbm [resolvable:$true] %s903_s8 }
  0xb3   : > { %s905_s19 = scalar_lea.hbm %s904_s8, 552  ;;  %p910_p9 = scmp.lt.s32.totalorder %s904_s8, %s1331_s4 }
  0xb4   : > { %p906_p3 = scmp.ne.s32.totalorder %s904_s8, %s905_s19  ;;  %p911_p0 = scmp.lt.s32.totalorder %s909_s25, %s905_s19 }
  0xb6   : > { %p907_p10 = pnand %p906_p3, %p1041_p11  ;;  %p912_p1 = por %p911_p0, %p910_p9 }
  0xb7   : > { %333 = vxpose.xlu0.b32.cont [15/16] (narrow) %v317_v30, 32 }
  0xb8   : > { %p908_p2 = pneg %p907_p10 }
  0xb9   : > { %402 = vxpose.xlu1.b32.end [16/16] %v385_v32, 128 }
  0xba   : > { %434 = vxpose.xlu2.b32.end [16/16] %v386_v17, 128  ;;  %p913_p4 = pnand %p912_p1, %p908_p2 }
  0xbf   : > { %334 = vxpose.xlu0.b32.end [16/16] (narrow) %v318_v33, 32 }
  0xc1   : > { %547 = vxpose.xlu1.b32.start [1/16] %v484_v35, 128 }
  0xc7   : > { %515 = vxpose.xlu0.b32.start [1/16] %v483_v36, 128 }
  0xc9   : > { %548 = vxpose.xlu1.b32.cont [2/16] %v486_v38, 128 }
  0xcf   : > { %516 = vxpose.xlu0.b32.cont [2/16] %v485_v39, 128 }
  0xd1   : > { %549 = vxpose.xlu1.b32.cont [3/16] %v488_v41, 128 }
  0xd7   : > { %517 = vxpose.xlu0.b32.cont [3/16] %v487_v42, 128 }
  0xd9   : > { %550 = vxpose.xlu1.b32.cont [4/16] %v490_v44, 128 }
  0xdb   : > { %v435_v32 = vpop.trf.xlu2 }
  0xdc   : > { %467 = vst [vmem:[%s1187_s7 + $0xa0] sm:$0xff] %v435_v32 }
  0xdf   : > { %518 = vxpose.xlu0.b32.cont [4/16] %v489_v45, 128 }
  0xe1   : > { %551 = vxpose.xlu1.b32.cont [5/16] %v492_v47, 128 }
  0xe3   : > { %v436_v34 = vpop.trf.xlu2 }
  0xe4   : > { %468 = vst [vmem:[%s1187_s7 + $0xa8] sm:$0xff] %v436_v34 }
  0xe5   : > { %v403_v50 = vpop.trf.xlu1 }
  0xe6   : > { %451 = vst [vmem:[%s1187_s7 + $0x20] sm:$0xff] %v403_v50 }
  0xe7   : > { %519 = vxpose.xlu0.b32.cont [5/16] %v491_v48, 128 }
  0xe9   : > { %552 = vxpose.xlu1.b32.cont [6/16] %v494_v51, 128 }
  0xeb   : > { %v335_v19 = vpop.trf.xlu0  ;;  %v437_v36 = vpop.trf.xlu2 }
  0xec   : > { %351 = vst [vmem:[%s1187_s7] sm:$0xff] %v335_v19 }
  0xed   : > { %v404_v54 = vpop.trf.xlu1  ;;  %469 = vst [vmem:[%s1187_s7 + $0xb0] sm:$0xff] %v437_v36 }
  0xee   : > { %452 = vst [vmem:[%s1187_s7 + $0x28] sm:$0xff] %v404_v54 }
  0xef   : > { %520 = vxpose.xlu0.b32.cont [6/16] %v493_v52, 128 }
  0xf1   : > { %553 = vxpose.xlu1.b32.cont [7/16] %v496_v55, 128 }
  0xf3   : > { %v336_v23 = vpop.trf.xlu0  ;;  %v438_v38 = vpop.trf.xlu2 }
  0xf4   : > { %352 = vst [vmem:[%s1187_s7 + $0x8] sm:$0xff] %v336_v23 }
  0xf5   : > { %v405_v58 = vpop.trf.xlu1  ;;  %470 = vst [vmem:[%s1187_s7 + $0xb8] sm:$0xff] %v438_v38 }
  0xf6   : > { %453 = vst [vmem:[%s1187_s7 + $0x30] sm:$0xff] %v405_v58 }
  0xf7   : > { %521 = vxpose.xlu0.b32.cont [7/16] %v495_v56, 128 }
  0xf9   : > { %554 = vxpose.xlu1.b32.cont [8/16] %v498_v59, 128 }
  0xfb   : > { %v337_v27 = vpop.trf.xlu0  ;;  %v439_v40 = vpop.trf.xlu2 }
  0xfc   : > { %353 = vst [vmem:[%s1187_s7 + $0x10] sm:$0xff] %v337_v27 }
  0xfd   : > { %v406_v62 = vpop.trf.xlu1  ;;  %471 = vst [vmem:[%s1187_s7 + $0xc0] sm:$0xff] %v439_v40 }
  0xfe   : > { %454 = vst [vmem:[%s1187_s7 + $0x38] sm:$0xff] %v406_v62 }
  0xff   : > { %522 = vxpose.xlu0.b32.cont [8/16] %v497_v60, 128 }
 0x101   : > { %555 = vxpose.xlu1.b32.cont [9/16] %v500_v63, 128 }
 0x103   : > { %v338_v31 = vpop.trf.xlu0  ;;  %v440_v43 = vpop.trf.xlu2 }
 0x104   : > { %354 = vst [vmem:[%s1187_s7 + $0x18] sm:$0xff] %v338_v31 }
 0x105   : > { %v407_v2 = vpop.trf.xlu1  ;;  %472 = vst [vmem:[%s1187_s7 + $0xc8] sm:$0xff] %v440_v43 }
 0x106   : > { %455 = vst [vmem:[%s1187_s7 + $0x40] sm:$0xff] %v407_v2 }
 0x107   : > { %523 = vxpose.xlu0.b32.cont [9/16] %v499_v0, 128 }
 0x109   : > { %556 = vxpose.xlu1.b32.cont [10/16] %v502_v3, 128 }
 0x10b   : > { %v441_v46 = vpop.trf.xlu2 }
 0x10c   : > { %473 = vst [vmem:[%s1187_s7 + $0xd0] sm:$0xff] %v441_v46 }
 0x10d   : > { %v408_v6 = vpop.trf.xlu1 }
 0x10e   : > { %456 = vst [vmem:[%s1187_s7 + $0x48] sm:$0xff] %v408_v6 }
 0x10f   : > { %524 = vxpose.xlu0.b32.cont [10/16] %v501_v4, 128 }
 0x111   : > { %557 = vxpose.xlu1.b32.cont [11/16] %v504_v7, 128 }
 0x113   : > { %v442_v49 = vpop.trf.xlu2 }
 0x114   : > { %474 = vst [vmem:[%s1187_s7 + $0xd8] sm:$0xff] %v442_v49 }
 0x115   : > { %v409_v10 = vpop.trf.xlu1 }
 0x116   : > { %457 = vst [vmem:[%s1187_s7 + $0x50] sm:$0xff] %v409_v10 }
 0x117   : > { %525 = vxpose.xlu0.b32.cont [11/16] %v503_v8, 128 }
 0x119   : > { %558 = vxpose.xlu1.b32.cont [12/16] %v506_v11, 128 }
 0x11b   : > { %v443_v52 = vpop.trf.xlu2 }
 0x11c   : > { %475 = vst [vmem:[%s1187_s7 + $0xe0] sm:$0xff] %v443_v52 }
 0x11d   : > { %v410_v14 = vpop.trf.xlu1 }
 0x11e   : > { %458 = vst [vmem:[%s1187_s7 + $0x58] sm:$0xff] %v410_v14 }
 0x11f   : > { %526 = vxpose.xlu0.b32.cont [12/16] %v505_v12, 128  ;;  %v611_v12 = vld [vmem:[%s302_s30] sm:$0xf] }
 0x120   : > { %612 = vst [vmem:[%s1187_s7 + $0x220] sm:$0xf] %v611_v12 }
 0x121   : > { %559 = vxpose.xlu1.b32.cont [13/16] %v508_v15, 128 }
 0x123   : > { %v444_v55 = vpop.trf.xlu2 }
 0x124   : > { %476 = vst [vmem:[%s1187_s7 + $0xe8] sm:$0xff] %v444_v55 }
 0x125   : > { %v411_v18 = vpop.trf.xlu1 }
 0x126   : > { %459 = vst [vmem:[%s1187_s7 + $0x60] sm:$0xff] %v411_v18 }
 0x127   : > { %527 = vxpose.xlu0.b32.cont [13/16] %v507_v16, 128 }
 0x129   : > { %560 = vxpose.xlu1.b32.cont [14/16] %v510_v20, 128 }
 0x12b   : > { %v445_v58 = vpop.trf.xlu2 }
 0x12c   : > { %477 = vst [vmem:[%s1187_s7 + $0xf0] sm:$0xff] %v445_v58 }
 0x12d   : > { %v412_v22 = vpop.trf.xlu1 }
 0x12e   : > { %460 = vst [vmem:[%s1187_s7 + $0x68] sm:$0xff] %v412_v22 }
 0x12f   : > { %528 = vxpose.xlu0.b32.cont [14/16] %v509_v21, 128 }
 0x131   : > { %561 = vxpose.xlu1.b32.cont [15/16] %v512_v24, 128 }
 0x133   : > { %v446_v61 = vpop.trf.xlu2 }
 0x134   : > { %478 = vst [vmem:[%s1187_s7 + $0xf8] sm:$0xff] %v446_v61 }
 0x135   : > { %v413_v26 = vpop.trf.xlu1 }
 0x136   : > { %461 = vst [vmem:[%s1187_s7 + $0x70] sm:$0xff] %v413_v26 }
 0x137   : > { %529 = vxpose.xlu0.b32.cont [15/16] %v511_v25, 128 }
 0x139   : > { %562 = vxpose.xlu1.b32.end [16/16] %v514_v28, 128 }
 0x13b   : > { %v447_v0 = vpop.trf.xlu2 }
 0x13c   : > { %479 = vst [vmem:[%s1187_s7 + $0x100] sm:$0xff] %v447_v0 }
 0x13d   : > { %v414_v30 = vpop.trf.xlu1 }
 0x13e   : > { %462 = vst [vmem:[%s1187_s7 + $0x78] sm:$0xff] %v414_v30 }
 0x13f   : > { %530 = vxpose.xlu0.b32.end [16/16] %v513_v29, 128 }
 0x143   : > { %v448_v3 = vpop.trf.xlu2 }
 0x144   : > { %480 = vst [vmem:[%s1187_s7 + $0x108] sm:$0xff] %v448_v3 }
 0x145   : > { %v415_v33 = vpop.trf.xlu1 }
 0x146   : > { %463 = vst [vmem:[%s1187_s7 + $0x80] sm:$0xff] %v415_v33 }
 0x14b   : > { %v449_v6 = vpop.trf.xlu2 }
 0x14c   : > { %481 = vst [vmem:[%s1187_s7 + $0x110] sm:$0xff] %v449_v6 }
 0x14d   : > { %v416_v35 = vpop.trf.xlu1 }
 0x14e   : > { %464 = vst [vmem:[%s1187_s7 + $0x88] sm:$0xff] %v416_v35 }
 0x153   : > { %v450_v9 = vpop.trf.xlu2 }
 0x154   : > { %482 = vst [vmem:[%s1187_s7 + $0x118] sm:$0xff] %v450_v9 }
 0x155   : > { %v417_v37 = vpop.trf.xlu1 }
 0x156   : > { %465 = vst [vmem:[%s1187_s7 + $0x90] sm:$0xff] %v417_v37 }
 0x15d   : > { %v418_v39 = vpop.trf.xlu1 }
 0x15e   : > { %466 = vst [vmem:[%s1187_s7 + $0x98] sm:$0xff] %v418_v39 }
 0x165   : > { %v563_v41 = vpop.trf.xlu1 }
 0x166   : > { %595 = vst [vmem:[%s1187_s7 + $0x1a0] sm:$0xff] %v563_v41 }
 0x16b   : > { %v531_v42 = vpop.trf.xlu0 }
 0x16c   : > { %579 = vst [vmem:[%s1187_s7 + $0x120] sm:$0xff] %v531_v42 }
 0x16d   : > { %v564_v44 = vpop.trf.xlu1 }
 0x16e   : > { %596 = vst [vmem:[%s1187_s7 + $0x1a8] sm:$0xff] %v564_v44 }
 0x173   : > { %v532_v45 = vpop.trf.xlu0 }
 0x174   : > { %580 = vst [vmem:[%s1187_s7 + $0x128] sm:$0xff] %v532_v45 }
 0x175   : > { %v565_v47 = vpop.trf.xlu1 }
 0x176   : > { %597 = vst [vmem:[%s1187_s7 + $0x1b0] sm:$0xff] %v565_v47 }
 0x17b   : > { %v533_v48 = vpop.trf.xlu0 }
 0x17c   : > { %581 = vst [vmem:[%s1187_s7 + $0x130] sm:$0xff] %v533_v48 }
 0x17d   : > { %v566_v50 = vpop.trf.xlu1 }
 0x17e   : > { %598 = vst [vmem:[%s1187_s7 + $0x1b8] sm:$0xff] %v566_v50 }
 0x183   : > { %v534_v51 = vpop.trf.xlu0 }
 0x184   : > { %582 = vst [vmem:[%s1187_s7 + $0x138] sm:$0xff] %v534_v51 }
 0x185   : > { %v567_v53 = vpop.trf.xlu1 }
 0x186   : > { %599 = vst [vmem:[%s1187_s7 + $0x1c0] sm:$0xff] %v567_v53 }
 0x18b   : > { %v535_v54 = vpop.trf.xlu0 }
 0x18c   : > { %583 = vst [vmem:[%s1187_s7 + $0x140] sm:$0xff] %v535_v54 }
 0x18d   : > { %v568_v56 = vpop.trf.xlu1 }
 0x18e   : > { %600 = vst [vmem:[%s1187_s7 + $0x1c8] sm:$0xff] %v568_v56 }
 0x193   : > { %v536_v57 = vpop.trf.xlu0 }
 0x194   : > { %584 = vst [vmem:[%s1187_s7 + $0x148] sm:$0xff] %v536_v57 }
 0x195   : > { %v569_v59 = vpop.trf.xlu1 }
 0x196   : > { %601 = vst [vmem:[%s1187_s7 + $0x1d0] sm:$0xff] %v569_v59 }
 0x19b   : > { %v537_v60 = vpop.trf.xlu0 }
 0x19c   : > { %585 = vst [vmem:[%s1187_s7 + $0x150] sm:$0xff] %v537_v60 }
 0x19d   : > { %v570_v62 = vpop.trf.xlu1 }
 0x19e   : > { %602 = vst [vmem:[%s1187_s7 + $0x1d8] sm:$0xff] %v570_v62 }
 0x1a3   : > { %v538_v63 = vpop.trf.xlu0 }
 0x1a4   : > { %586 = vst [vmem:[%s1187_s7 + $0x158] sm:$0xff] %v538_v63 }
 0x1a5   : > { %v571_v1 = vpop.trf.xlu1 }
 0x1a6   : > { %603 = vst [vmem:[%s1187_s7 + $0x1e0] sm:$0xff] %v571_v1 }
 0x1ab   : > { %v539_v2 = vpop.trf.xlu0 }
 0x1ac   : > { %587 = vst [vmem:[%s1187_s7 + $0x160] sm:$0xff] %v539_v2 }
 0x1ad   : > { %v572_v4 = vpop.trf.xlu1 }
 0x1ae   : > { %604 = vst [vmem:[%s1187_s7 + $0x1e8] sm:$0xff] %v572_v4 }
 0x1b3   : > { %v540_v5 = vpop.trf.xlu0 }
 0x1b4   : > { %588 = vst [vmem:[%s1187_s7 + $0x168] sm:$0xff] %v540_v5 }
 0x1b5   : > { %v573_v7 = vpop.trf.xlu1 }
 0x1b6   : > { %605 = vst [vmem:[%s1187_s7 + $0x1f0] sm:$0xff] %v573_v7 }
 0x1bb   : > { %v541_v8 = vpop.trf.xlu0 }
 0x1bc   : > { %589 = vst [vmem:[%s1187_s7 + $0x170] sm:$0xff] %v541_v8 }
 0x1bd   : > { %v574_v10 = vpop.trf.xlu1 }
 0x1be   : > { %606 = vst [vmem:[%s1187_s7 + $0x1f8] sm:$0xff] %v574_v10 }
 0x1c3   : > { %v542_v11 = vpop.trf.xlu0 }
 0x1c4   : > { %590 = vst [vmem:[%s1187_s7 + $0x178] sm:$0xff] %v542_v11 }
 0x1c5   : > { %v575_v13 = vpop.trf.xlu1 }
 0x1c6   : > { %607 = vst [vmem:[%s1187_s7 + $0x200] sm:$0xff] %v575_v13 }
 0x1cb   : > { %v543_v14 = vpop.trf.xlu0 }
 0x1cc   : > { %591 = vst [vmem:[%s1187_s7 + $0x180] sm:$0xff] %v543_v14 }
 0x1cd   : > { %v576_v15 = vpop.trf.xlu1 }
 0x1ce   : > { %608 = vst [vmem:[%s1187_s7 + $0x208] sm:$0xff] %v576_v15 }
 0x1d3   : > { %v544_v16 = vpop.trf.xlu0 }
 0x1d4   : > { %592 = vst [vmem:[%s1187_s7 + $0x188] sm:$0xff] %v544_v16 }
 0x1d5   : > { %v577_v17 = vpop.trf.xlu1 }
 0x1d6   : > { %609 = vst [vmem:[%s1187_s7 + $0x210] sm:$0xff] %v577_v17 }
 0x1db   : > { %v545_v18 = vpop.trf.xlu0 }
 0x1dc   : > { %593 = vst [vmem:[%s1187_s7 + $0x190] sm:$0xff] %v545_v18 }
 0x1dd   : > { %v578_v19 = vpop.trf.xlu1 }
 0x1de   : > { %610 = vst [vmem:[%s1187_s7 + $0x218] sm:$0xff] %v578_v19 }
 0x1e3   : > { %v546_v20 = vpop.trf.xlu0 }
 0x1e4   : > { %594 = vst [vmem:[%s1187_s7 + $0x198] sm:$0xff] %v546_v20 }
 0x1e5   : > { %916 = shalt.err (!%p913_p4)
}
 0x1e6   : > { %s963_s29 = smov 128   ;;  %s964_s7 = smov 256  }
 0x1e7   : > { %s965_s11 = smov 8  }
 0x1e8   : > { %777 = dma.vmem_to_hbm [thread:$0]  (%p1041_p11), %s626_s1, 8832, %s628_s24, %s614_s12, %s963_s29, %s964_s7, %s965_s11  }
 0x1e9 PF: > { %s642_s13 = sand.u32 1, %s947_s15   ;;  %p1341_p7 = scmp.ge.s32.totalorder %s959_s18, 2 }
 0x1ea   : > { %s643_s14 = scalar_lea.sflag [#allocation4], %s642_s13 }
 0x1eb   : > { %p787_p5 = pnand %p1341_p7, %p1045_p12 }
 0x1ed   : > { %p788_p8 = pneg %p787_p5 }
 0x1ef   : > { %942 = dma.done.wait (%p788_p8), %s643_s14, 8832  }
 0x1f0   : > { %944 = vsyncadd (%p788_p8), %s643_s14, 4294958464  ;;  %s1342_s30 = sld [smem:[#allocation11_spill]]  ;;  %p20_p13 = scmp.ge.s32.totalorder %s1016_s21, 4  }
 0x1f1   : > { %s1343_s15 = smov %s951_s16  ;;  %s1344_s16 = smov %s955_s17 }
 0x1f2   : > { %s1346_s18 = smov %s1016_s21  ;;  %22 = sbr.rel (!%p20_p13) target bundleno = 9 (0x9), region = 100 }
 0x1f6   : > { %s1345_s17 = smov %s1342_s30 }
 0x1f7   :  { %649 = vsyncpa [#allocation3], 1 }
 0x1f8   :  { %651 = vsyncpa [#allocation3 + $0x1], 1 }
 0x1f9   :  { %652 = vsyncpa [#allocation6], 1 }
 0x1fa   :  { %654 = vsyncpa [#allocation6 + $0x1], 1 }
 0x1fb   :  { %655 = vsyncpa [#allocation4], 1 }
 0x1fc   :  { %657 = vsyncpa [#allocation4 + $0x1], 1 }

</bundles_post_ra>
